<compile_context>
chip_gen: v5e
topology: v5e:2x2
jax: 0.10.0
libtpu: 0.0.40
codegen_flags: <defaults>
</compile_context>

<pallas_src>
import functools
import math

import jax
import jax.numpy as jnp
from jax import lax
from jax.experimental import pallas as pl
from jax.experimental.pallas import tpu as pltpu


def _js_partial_kernel(p_ref, q_ref, out_ref, *, eps, log_half, total, needs_mask):
    """Per-tile partial sums of p*(log p - m) + q*(log q - m), reduced over sublanes."""
    p = p_ref[...].astype(jnp.float32)
    q = q_ref[...].astype(jnp.float32)

    s = p + q
    # m = clamp(log(0.5 * s), min=eps); log(0.5) folded in as an additive constant.
    m = jnp.maximum(jnp.log(s) + jnp.float32(log_half), jnp.float32(eps))
    # p*(log p - m) + q*(log q - m) == p*log p + q*log q - (p+q)*m
    term = p * jnp.log(p) + q * jnp.log(q) - s * m

    if needs_mask:
        # Only the padded tail (flat index >= total) is zeroed; padding value 1.0
        # keeps all intermediate values finite, the select discards them.
        br, bc = term.shape
        row0 = pl.program_id(0) * br
        rows = lax.broadcasted_iota(jnp.int32, (br, bc), 0) + row0
        cols = lax.broadcasted_iota(jnp.int32, (br, bc), 1)
        flat = rows * bc + cols
        term = jnp.where(flat < total, term, jnp.float32(0.0))

    # Reduce only across the sublane axis; lanes stay intact (cheap, mostly VALU).
    out_ref[...] = jnp.sum(term, axis=0, keepdims=True)


def js_divergence(p, q, beta_=1.0, eps=1e-7):
    """Pallas implementation of Divergence.forward(p, q). beta_ is unused in forward."""
    del beta_  # stored in the PyTorch module but never used in forward

    D = p.shape[-1]
    total = int(p.size)
    n_rows = total // D                 # N used by KLDivLoss(reduction='batchmean')
    inv_n = 1.0 / float(n_rows)

    # Lane-dense layout parameters.
    C = 512                             # lane width: large multiple of 128
    TM_MAX = 1024                       # (1024, 512) f32 block = 2 MiB per input
                                        # -> 2 inputs x 2 buffers = 8 MiB VMEM
                                        #    (fits default scoped VMEM on v5e/v6e/v7x)

    rows_needed = -(-total // C)        # ceil(total / C)
    if rows_needed <= TM_MAX:
        tm = rows_needed                # single tile; block == full array dims
        rows = rows_needed
    else:
        tm = TM_MAX
        rows = -(-rows_needed // tm) * tm
    grid = rows // tm
    padded_total = rows * C
    pad = padded_total - total
    needs_mask = pad > 0

    pf = p.reshape(-1)
    qf = q.reshape(-1)
    if pad:
        # Pad with 1.0 so log() stays finite; padded entries are masked in-kernel.
        pf = jnp.concatenate([pf, jnp.ones((pad,), dtype=pf.dtype)])
        qf = jnp.concatenate([qf, jnp.ones((pad,), dtype=qf.dtype)])
    p2 = pf.reshape(rows, C)
    q2 = qf.reshape(rows, C)

    kernel = functools.partial(
        _js_partial_kernel,
        eps=float(eps),
        log_half=math.log(0.5),
        total=total,
        needs_mask=needs_mask,
    )

    partials = pl.pallas_call(
        kernel,
        out_shape=jax.ShapeDtypeStruct((grid, C), jnp.float32),
        grid_spec=pltpu.PrefetchScalarGridSpec(
            num_scalar_prefetch=0,
            grid=(grid,),
            in_specs=[
                pl.BlockSpec((tm, C), lambda i: (i, 0)),
                pl.BlockSpec((tm, C), lambda i: (i, 0)),
            ],
            out_specs=pl.BlockSpec((1, C), lambda i: (i, 0)),
        ),
        compiler_params=pltpu.CompilerParams(
            # Each grid step writes its own partial row -> fully parallel, so on
            # v7x the two TensorCores can split the (memory-bound) reduction.
            dimension_semantics=("parallel",),
        ),
    )(p2, q2)

    # Tiny final reduction (grid x 512 f32) + batchmean scaling in plain JAX.
    return jnp.float32(0.5) * jnp.float32(inv_n) * jnp.sum(partials)


def _reference(p, q, eps=1e-7):
    D = p.shape[-1]
    p2 = p.reshape(-1, D).astype(jnp.float32)
    q2 = q.reshape(-1, D).astype(jnp.float32)
    N = p2.shape[0]
    m = jnp.maximum(jnp.log(0.5 * (p2 + q2)), eps)
    kl_pm = jnp.sum(p2 * (jnp.log(p2) - m)) / N
    kl_qm = jnp.sum(q2 * (jnp.log(q2) - m)) / N
    return 0.5 * (kl_pm + kl_qm)


if __name__ == "__main__":
    key = jax.random.PRNGKey(0)
    k1, k2 = jax.random.split(key)

    # Small shapes consistent with the module: similarity lists -> softmax rows.
    # p, q: (batch=2, groups=8, D=32) -> flattened inside the module to (16, 32).
    batch, groups, D = 2, 8, 32
    logits_p = jax.random.normal(k1, (batch, groups, D), dtype=jnp.float32)
    logits_q = jax.random.normal(k2, (batch, groups, D), dtype=jnp.float32)
    p = jax.nn.softmax(logits_p, axis=-1)
    q = jax.nn.softmax(logits_q, axis=-1)

    out = js_divergence(p, q, beta_=1.0)
    out = jax.block_until_ready(out)

    ref = _reference(p, q)
    assert jnp.allclose(out, ref, rtol=1e-5, atol=1e-6), (out, ref)

    print("KERNEL_OK")
</pallas_src>

<mosaic_0001>
module attributes {stable_mosaic.version = 11 : i64} {
  func.func @_js_partial_kernel(%arg0: i32, %arg1: memref<1x512xf32, #tpu.memory_space<vmem>>, %arg2: memref<1x512xf32, #tpu.memory_space<vmem>>, %arg3: memref<1x512xf32, #tpu.memory_space<vmem>>) attributes {dimension_semantics = [#tpu.dimension_semantics<parallel>], iteration_bounds = array<i64: 1>, scalar_prefetch = 0 : i64, scratch_operands = 0 : i64, tpu.core_type = #tpu.core_type<tc>, window_params = [{transform_indices = @transform_0, window_bounds = array<i64: 1, 512>}, {transform_indices = @transform_1, window_bounds = array<i64: 1, 512>}, {transform_indices = @transform_2, window_bounds = array<i64: 1, 512>}]} {
    %c0 = arith.constant 0 : index
    %c0_0 = arith.constant 0 : index
    %0 = vector.load %arg1[%c0, %c0_0] : memref<1x512xf32, #tpu.memory_space<vmem>>, vector<1x512xf32>
    %c0_1 = arith.constant 0 : index
    %c0_2 = arith.constant 0 : index
    %1 = vector.load %arg2[%c0_1, %c0_2] : memref<1x512xf32, #tpu.memory_space<vmem>>, vector<1x512xf32>
    %2 = arith.addf %0, %1 : vector<1x512xf32>
    %3 = math.log %2 : vector<1x512xf32>
    %cst = arith.constant -0.693147182 : f32
    %4 = vector.broadcast %cst : f32 to vector<1x512xf32>
    %5 = arith.addf %3, %4 : vector<1x512xf32>
    %cst_3 = arith.constant 1.000000e-07 : f32
    %6 = vector.broadcast %cst_3 : f32 to vector<1x512xf32>
    %7 = arith.maximumf %5, %6 : vector<1x512xf32>
    %8 = math.log %0 : vector<1x512xf32>
    %9 = arith.mulf %0, %8 : vector<1x512xf32>
    %10 = math.log %1 : vector<1x512xf32>
    %11 = arith.mulf %1, %10 : vector<1x512xf32>
    %12 = arith.addf %9, %11 : vector<1x512xf32>
    %13 = arith.mulf %2, %7 : vector<1x512xf32>
    %14 = arith.subf %12, %13 : vector<1x512xf32>
    %cst_4 = arith.constant dense<0.000000e+00> : vector<512xf32>
    %15 = vector.multi_reduction <add>, %14, %cst_4 [0] : vector<1x512xf32> to vector<512xf32>
    %16 = vector.shape_cast %15 : vector<512xf32> to vector<1x512xf32>
    %c0_5 = arith.constant 0 : index
    %c0_6 = arith.constant 0 : index
    %17 = vector.load %arg3[%c0_5, %c0_6] : memref<1x512xf32, #tpu.memory_space<vmem>>, vector<1x512xf32>
    tpu.vector_store %arg3[%c0_5, %c0_6], %16 {strides = array<i32>} : memref<1x512xf32, #tpu.memory_space<vmem>>, vector<1x512xf32>,
    return
  }
  func.func @transform_0(%arg0: i32) -> (i32, i32) {
    %c0_i32 = arith.constant 0 : i32
    %c0_i32_0 = arith.constant 0 : i32
    return %arg0, %c0_i32 : i32, i32
  }
  func.func @transform_1(%arg0: i32) -> (i32, i32) {
    %c0_i32 = arith.constant 0 : i32
    %c0_i32_0 = arith.constant 0 : i32
    return %arg0, %c0_i32 : i32, i32
  }
  func.func @transform_2(%arg0: i32) -> (i32, i32) {
    %c0_i32 = arith.constant 0 : i32
    %c0_i32_0 = arith.constant 0 : i32
    return %arg0, %c0_i32 : i32, i32
  }
}

</mosaic_0001>

<bundles_post_ra>
// kernel: tpu_custom_call.1
= control target key start
LH: loop header
LB: loop body
LE: loop exit
PB: predicated region body
PF: predicated region fallthrough
CT: control target
= control target key end

     0   :  { %7 = vsyncpa [#allocation3], 0  ;;  %s194_s0 = inlined_call_operand.hbm [shape: f32[1,512], index: 0, kind: input, shape index: {}]   ;;  %s195_s1 = inlined_call_operand.hbm [shape: f32[1,512], index: 1, kind: input, shape index: {}]   ;;  %s196_s2 = inlined_call_operand.hbm [shape: f32[1,512], index: 2, kind: output, shape index: {}]  }
   0x1   :  { %8 = vsyncpa [#allocation6], 0 }
   0x2   :  { %9 = vsyncpa [#allocation4], 0  ;;  %s15_s11 = sshll.u32 %s194_s0, 4  ;;  %s167_s12 = smov [#allocation2]   ;;  %s16_s11 = int_to_ptr.hbm [resolvable:$true] %s15_s11 }
   0x3   :  { %s17_s13 = sshll.u32 %s167_s12, 4  ;;  %s26_s16 = sshll.u32 %s195_s1, 4  ;;  %s18_s13 = int_to_ptr.vmem [resolvable:$true] %s17_s13  ;;  %s27_s16 = int_to_ptr.hbm [resolvable:$true] %s26_s16 }
   0x4   :  { %20 = dma.hbm_to_vmem [thread:$0]  %s16_s11, 64, %s18_s13, [#allocation3]  }
   0x5   :  { %s168_s17 = smov [#allocation5]  }
   0x6   :  { %s28_s18 = sshll.u32 %s168_s17, 4  ;;  %s29_s18 = int_to_ptr.vmem [resolvable:$true] %s28_s18 }
   0x7   :  { %31 = dma.hbm_to_vmem [thread:$0]  %s27_s16, 64, %s29_s18, [#allocation6]  }
   0x8   :  { %161 = dma.done.wait [#allocation3], 64  }
   0x9   :  { %162 = vsyncadd [#allocation3], 4294967232 }
   0xa   :  { %163 = dma.done.wait [#allocation6], 64  }
   0xb   :  { %164 = vsyncadd [#allocation6], 4294967232  ;;  %v40_v0 = vld [vmem:[#allocation2] sm:$0xf]  ;;  %v41_v1 = vld [vmem:[#allocation5] sm:$0xf]  ;;  %v57_v12 = vlaneseq }
   0xc   :  { %v42_v2 = vadd.f32 %v41_v1, %v40_v0  ;;  %83 = vlog2.f32 %v40_v0  ;;  %s169_s0 = smov [#allocation7]   ;;  %s69_s21 = sshll.u32 %s196_s2, 4  ;;  %s70_s21 = int_to_ptr.hbm [resolvable:$true] %s69_s21 }
   0xd   :  { %85 = vlog2.f32 %v41_v1  ;;  %s67_s1 = sshll.u32 %s169_s0, 4  ;;  %vm59_vm0 = vcmp.lt.s32.totalorder %v57_v12, 512  ;;  %s68_s1 = int_to_ptr.vmem [resolvable:$true] %s67_s1 }
   0xe   :  { %87 = vlog2.f32 %v42_v2 }
  0x12   :  { %v84_v3 = vpop.eup %83 }
  0x13   :  { %v86_v4 = vpop.eup %85  ;;  %v48_v5 = vmul.f32 0.6931472, %v84_v3 }
  0x14   :  { %v88_v6 = vpop.eup %87  ;;  %v51_v7 = vmul.f32 0.6931472, %v86_v4 }
  0x15   :  { %v44_v8 = vmul.f32 0.6931472, %v88_v6  ;;  %v49_v9 = vmul.f32 %v48_v5, %v40_v0 }
  0x16   :  { %v52_v10 = vmul.f32 %v51_v7, %v41_v1 }
  0x17   :  { %v45_v11 = vadd.f32 -0.6931472, %v44_v8 }
  0x18   :  { %v53_v14 = vadd.f32 %v52_v10, %v49_v9 }
  0x19   :  { %v46_v13 = vmax.f32 %v45_v11, 1e-07 }
  0x1b   :  { %v54_v15 = vmul.f32 %v46_v13, %v42_v2 }
  0x1d   :  { %v55_v16 = vsub.f32 %v53_v14, %v54_v15 }
  0x1f   :  { %61 = vst.msk [vmem:[#allocation7] sm:$0xf] %vm59_vm0, %v55_v16 }
  0x20   :  { %72 = dma.vmem_to_hbm [thread:$0]  %s68_s1, 64, %s70_s21, [#allocation4]  }
  0x21   :  { %165 = dma.done.wait [#allocation4], 64  }
  0x22   :  { %166 = vsyncadd [#allocation4], 4294967232 }
  0x23   :  { %77 = vsyncpa [#allocation3], 1 }
  0x24   :  { %78 = vsyncpa [#allocation6], 1 }
  0x25   :  { %79 = vsyncpa [#allocation4], 1 }

</bundles_post_ra>
